<compile_context>
chip_gen: v7x
topology: tpu7x:2x2x1
jax: 0.10.0
libtpu: 0.0.40
codegen_flags: <defaults>
</compile_context>

<pallas_src>
import jax
import jax.numpy as jnp
from jax.experimental import pallas as pl
from jax.experimental.pallas import tpu as pltpu

_LANES = 128
_SUBLANES = 8
_WIDTH = 8 * _LANES                      # 1024-lane-wide slab (lane-dense)
_TARGET_BLOCK_BYTES = 2 * 1024 * 1024    # ~2 MiB per pipelined block


def model_kernel(x_ref, o_ref):
    """Identity forward: out = in.

    A concrete subclass of `Model` would replace this body with its actual
    compute (matmul / conv / activation) operating on the VMEM tile.
    """
    o_ref[...] = x_ref[...]


def _cdiv(a, b):
    return -(-a // b)


def _round_up(v, m):
    return _cdiv(v, m) * m


def model_forward(x):
    """Pallas-backed forward for the abstract Model contract (identity).

    Accepts any-shape array (e.g. NCHW image batch); returns an array with the
    same shape, dtype and values.
    """
    orig_shape = x.shape
    n = x.size
    itemsize = x.dtype.itemsize

    # Sublane packing granularity: f32 -> 8, bf16 -> 16, int8 -> 32 rows.
    sub = _SUBLANES * max(1, 4 // itemsize)

    flat = x.reshape(-1)

    # ---- slab layout: (rows, _WIDTH), wide & lane-dense --------------------
    rows = _round_up(_cdiv(max(n, 1), _WIDTH), sub)

    # ---- grid / block sizing: ~2 MiB blocks, >=2 steps when possible -------
    target_rows = max(sub, _TARGET_BLOCK_BYTES // (_WIDTH * itemsize))
    grid = _cdiv(rows, target_rows)
    if grid == 1 and rows >= 2 * sub:
        grid = 2  # lets v7x's two TensorCores both drive DMA
    block_rows = _round_up(_cdiv(rows, grid), sub)
    padded_rows = grid * block_rows

    n_pad = padded_rows * _WIDTH
    if n_pad != n:
        flat = jnp.pad(flat, (0, n_pad - n))
    slab = flat.reshape(padded_rows, _WIDTH)

    block_bytes = block_rows * _WIDTH * itemsize
    vmem_limit = min(32 * 1024 * 1024, max(16 * 1024 * 1024, 6 * block_bytes))

    out_slab = pl.pallas_call(
        model_kernel,
        out_shape=jax.ShapeDtypeStruct((padded_rows, _WIDTH), slab.dtype),
        grid_spec=pltpu.PrefetchScalarGridSpec(
            num_scalar_prefetch=0,
            grid=(grid,),
            in_specs=[pl.BlockSpec((block_rows, _WIDTH), lambda i: (i, 0))],
            out_specs=pl.BlockSpec((block_rows, _WIDTH), lambda i: (i, 0)),
        ),
        compiler_params=pltpu.CompilerParams(
            dimension_semantics=("parallel",),
            vmem_limit_bytes=vmem_limit,
        ),
        cost_estimate=pl.CostEstimate(
            flops=0,
            transcendentals=0,
            bytes_accessed=2 * n_pad * itemsize,
        ),
    )(slab)

    if n_pad != n:
        out = out_slab.reshape(-1)[:n].reshape(orig_shape)
    else:
        out = out_slab.reshape(orig_shape)
    return out


if __name__ == "__main__":
    key = jax.random.PRNGKey(0)

    # Small NCHW input consistent with an RL vision model: batch=2, C=4, 16x16.
    x = jax.random.normal(key, (2, 4, 16, 16), dtype=jnp.float32)
    y = jax.block_until_ready(model_forward(x))
    assert y.shape == x.shape and y.dtype == x.dtype
    assert bool(jnp.allclose(y, x)), "identity forward mismatch (small input)"

    # Slightly larger, non-tile-friendly input to exercise the multi-step grid
    # and padding/tail paths.
    x2 = jax.random.normal(jax.random.PRNGKey(0), (4, 64, 64, 17),
                           dtype=jnp.float32)
    y2 = jax.block_until_ready(model_forward(x2))
    assert y2.shape == x2.shape and y2.dtype == x2.dtype
    assert bool(jnp.allclose(y2, x2)), "identity forward mismatch (grid input)"

    print("KERNEL_OK")
</pallas_src>

<mosaic_0001>
module attributes {stable_mosaic.version = 11 : i64} {
  func.func @model_kernel(%arg0: i32, %arg1: memref<8x1024xf32, #tpu.memory_space<vmem>>, %arg2: memref<8x1024xf32, #tpu.memory_space<vmem>>) attributes {dimension_semantics = [#tpu.dimension_semantics<parallel>], iteration_bounds = array<i64: 1>, scalar_prefetch = 0 : i64, scratch_operands = 0 : i64, tpu.core_type = #tpu.core_type<tc>, window_params = [{transform_indices = @transform_0, window_bounds = array<i64: 8, 1024>}, {transform_indices = @transform_1, window_bounds = array<i64: 8, 1024>}]} {
    %c0 = arith.constant 0 : index
    %c0_0 = arith.constant 0 : index
    %0 = vector.load %arg1[%c0, %c0_0] : memref<8x1024xf32, #tpu.memory_space<vmem>>, vector<8x1024xf32>
    %c0_1 = arith.constant 0 : index
    %c0_2 = arith.constant 0 : index
    %1 = vector.load %arg2[%c0_1, %c0_2] : memref<8x1024xf32, #tpu.memory_space<vmem>>, vector<8x1024xf32>
    tpu.vector_store %arg2[%c0_1, %c0_2], %0 {strides = array<i32>} : memref<8x1024xf32, #tpu.memory_space<vmem>>, vector<8x1024xf32>,
    return
  }
  func.func @transform_0(%arg0: i32) -> (i32, i32) {
    %c0_i32 = arith.constant 0 : i32
    %c0_i32_0 = arith.constant 0 : i32
    return %arg0, %c0_i32 : i32, i32
  }
  func.func @transform_1(%arg0: i32) -> (i32, i32) {
    %c0_i32 = arith.constant 0 : i32
    %c0_i32_0 = arith.constant 0 : i32
    return %arg0, %c0_i32 : i32, i32
  }
}

</mosaic_0001>

<bundles_post_ra>
// kernel: tpu_custom_call.1
= control target key start
LH: loop header
LB: loop body
LE: loop exit
PB: predicated region body
PF: predicated region fallthrough
CT: control target
= control target key end

     0   :  { %6 = vsyncpa [#allocation3], 0  ;;  %s138_s0 = inlined_call_operand.hbm [shape: f32[8,1024], index: 0, kind: input, shape index: {}]   ;;  %s139_s1 = inlined_call_operand.hbm [shape: f32[8,1024], index: 1, kind: output, shape index: {}]  }
   0x1   :  { %7 = vsyncpa [#allocation4], 0  ;;  %s102_s6 = smov [#allocation2]   ;;  %s54_s10 = scalar_lea.hbm %s138_s0, 1024 }
   0x2   :  { %s14_s7 = sshll.u32 %s102_s6, 4  ;;  %p55_p0 = scmp.ne.s32.totalorder %s138_s0, %s54_s10  ;;  %s15_s7 = int_to_ptr.vmem [resolvable:$true] %s14_s7 }
   0x3   :  { %p58_p1 = scmp.lt.u32.totalorder %s54_s10, %s138_s0 }
   0x5   :  { %p60_p2 = pnand %p58_p1, %p55_p0 }
   0x7   :  { %63 = shalt.err (!%p60_p2)
}
   0x8   :  { %s64_s15 = scalar_lea.vmem %s15_s7, 1024  ;;  %p69_p4 = scmp.lt.s32.totalorder %s15_s7, %s15_s7 }
   0x9   :  { %p65_p3 = scmp.ne.s32.totalorder %s15_s7, %s64_s15  ;;  %p70_p5 = scmp.lt.s32.totalorder %s64_s15, %s64_s15 }
   0xb   :  { %p71_p6 = por %p70_p5, %p69_p4 }
   0xd   :  { %p72_p7 = pnand %p71_p6, %p65_p3 }
   0xf   :  { %75 = shalt.err (!%p72_p7)
}
  0x10   :  { %17 = dma.hbm_to_vmem [thread:$0]  %s138_s0, 1024, %s15_s7, [#allocation3]  }
  0x11   :  { %98 = dma.done.wait [#allocation3], 1024  }
  0x12   :  { %99 = vsyncadd [#allocation3], 4294966272  ;;  %s103_s18 = smov [#allocation5]   ;;  %v21_v0 = vld [vmem:[#allocation2] sm:$0xff]  ;;  %v22_v1 = vld [vmem:[#allocation2 + $0x8] sm:$0xff] }
  0x13   :  { %s43_s19 = sshll.u32 %s103_s18, 4  ;;  %v23_v2 = vld [vmem:[#allocation2 + $0x10] sm:$0xff]  ;;  %29 = vst [vmem:[#allocation5] sm:$0xff] %v21_v0  ;;  %30 = vst [vmem:[#allocation5 + $0x8] sm:$0xff] %v22_v1  ;;  %v24_v3 = vld [vmem:[#allocation2 + $0x18] sm:$0xff]  ;;  %s44_s19 = int_to_ptr.vmem [resolvable:$true] %s43_s19 }
  0x14   :  { %31 = vst [vmem:[#allocation5 + $0x10] sm:$0xff] %v23_v2  ;;  %v25_v4 = vld [vmem:[#allocation2 + $0x20] sm:$0xff]  ;;  %v26_v5 = vld [vmem:[#allocation2 + $0x28] sm:$0xff]  ;;  %32 = vst [vmem:[#allocation5 + $0x18] sm:$0xff] %v24_v3  ;;  %s76_s0 = scalar_lea.vmem %s44_s19, 1024  ;;  %p81_p9 = scmp.lt.s32.totalorder %s44_s19, %s44_s19 }
  0x15   :  { %33 = vst [vmem:[#allocation5 + $0x20] sm:$0xff] %v25_v4  ;;  %34 = vst [vmem:[#allocation5 + $0x28] sm:$0xff] %v26_v5  ;;  %v27_v6 = vld [vmem:[#allocation2 + $0x30] sm:$0xff]  ;;  %v28_v7 = vld [vmem:[#allocation2 + $0x38] sm:$0xff]  ;;  %p77_p8 = scmp.ne.s32.totalorder %s44_s19, %s76_s0  ;;  %p82_p10 = scmp.lt.s32.totalorder %s76_s0, %s76_s0 }
  0x16   :  { %35 = vst [vmem:[#allocation5 + $0x30] sm:$0xff] %v27_v6  ;;  %36 = vst [vmem:[#allocation5 + $0x38] sm:$0xff] %v28_v7 }
  0x17   :  { %p83_p11 = por %p82_p10, %p81_p9 }
  0x19   :  { %p84_p12 = pnand %p83_p11, %p77_p8 }
  0x1b   :  { %87 = shalt.err (!%p84_p12)
}
  0x1c   :  { %s88_s22 = scalar_lea.hbm %s139_s1, 1024 }
  0x1d   :  { %p89_p13 = scmp.ne.s32.totalorder %s139_s1, %s88_s22  ;;  %p92_p0 = scmp.lt.u32.totalorder %s88_s22, %s139_s1 }
  0x1f   :  { %p94_p1 = pnand %p92_p0, %p89_p13 }
  0x21   :  { %97 = shalt.err (!%p94_p1)
}
  0x22   :  { %46 = dma.vmem_to_hbm [thread:$0]  %s44_s19, 1024, %s139_s1, [#allocation4]  }
  0x23   :  { %100 = dma.done.wait [#allocation4], 1024  }
  0x24   :  { %101 = vsyncadd [#allocation4], 4294966272 }
  0x25   :  { %50 = vsyncpa [#allocation3], 1 }
  0x26   :  { %51 = vsyncpa [#allocation4], 1 }

</bundles_post_ra>
